<compile_context>
chip_gen: v7x
topology: tpu7x:2x2x1
jax: 0.10.0
libtpu: 0.0.40
codegen_flags: <defaults>
</compile_context>

<pallas_src>
import functools

import jax
import jax.numpy as jnp
from jax.experimental import pallas as pl
from jax.experimental.pallas import tpu as pltpu


def _reference_forward(x, w1, b1, alpha, w2, b2):
    """Pure-JAX reference (also the tiny-batch fallback path)."""
    h = x @ w1.T + b1[:, 0]
    h = jnp.where(h >= 0.0, h, alpha[0] * h)
    return h @ w2.T + b2[:, 0]


def _event_encoder_kernel(xT_ref, w1_ref, b1_ref, w2_ref, b2_ref, alpha_ref, oT_ref):
    """Fused MLP on a lane-major batch tile.

    xT_ref:    (x_dim, TB)  VMEM tile of the batch (batch on lanes)
    w1_ref:    (H, x_dim)   full weight, PyTorch [out, in] layout
    b1_ref:    (H, 1)
    w2_ref:    (h_dim, H)
    b2_ref:    (h_dim, 1)
    alpha_ref: (1,)         PReLU shared slope, in SMEM
    oT_ref:    (h_dim, TB)
    """
    x = xT_ref[...]

    # First linear (MXU) + bias, f32 accumulation.
    h = jnp.dot(w1_ref[...], x, preferred_element_type=jnp.float32) + b1_ref[...]

    # PReLU with a single shared parameter (PyTorch default num_parameters=1).
    alpha = alpha_ref[0]
    h = jnp.where(h >= 0.0, h, alpha * h)

    # Second linear (MXU) + bias.
    out = jnp.dot(w2_ref[...], h, preferred_element_type=jnp.float32) + b2_ref[...]
    oT_ref[...] = out.astype(oT_ref.dtype)


def _pick_tile_n(n, requested):
    """Largest lane tile (multiple of 128, <= 2048) that still leaves >= 2 grid
    steps when the batch allows it (v7x has 2 TensorCores to feed)."""
    t = max(128, (min(requested, 2048) // 128) * 128)
    if n > 128:
        t = min(t, max(128, ((n - 1) // 128) * 128))  # keep t < n  =>  >= 2 steps
    return t


@functools.partial(jax.jit, static_argnames=("tile_n", "min_pallas_batch"))
def event_encoder_forward(x, w1, b1, alpha, w2, b2, *, tile_n=1024,
                          min_pallas_batch=256):
    """x: [N, x_dim] f32.  w1: [H, x_dim], b1: [H, 1], w2: [h_dim, H],
    b2: [h_dim, 1], alpha: [1].  Returns [N, h_dim] f32."""
    n, x_dim = x.shape
    H = w1.shape[0]
    h_dim = w2.shape[0]

    # Tiny batches: custom-call + grid-step overhead exceeds the whole compute;
    # let XLA fuse the two dots + PReLU instead of launching the kernel.
    if n < min_pallas_batch:
        return _reference_forward(x, w1, b1, alpha, w2, b2)

    tb = _pick_tile_n(n, tile_n)
    n_pad = tb * pl.cdiv(n, tb)          # ragged tail handled by zero padding

    # Lane-dense layout: batch on the last (128-lane) axis.
    xT = jnp.pad(x.T, ((0, 0), (0, n_pad - n)))

    grid = (n_pad // tb,)

    cost = pl.CostEstimate(
        flops=2 * n_pad * (x_dim * H + H * h_dim),
        transcendentals=0,
        bytes_accessed=4 * (n_pad * x_dim + H * x_dim + H
                            + h_dim * H + h_dim + n_pad * h_dim + 1),
    )

    # VMEM budget (per buffer): x tile 4*tb*4B + out tile h_dim*tb*4B + few-KB
    # weights -> well under the 32 MiB scoped default on every generation
    # (incl. v7x's 64 MiB physical), so no vmem_limit_bytes override needed.
    oT = pl.pallas_call(
        _event_encoder_kernel,
        out_shape=jax.ShapeDtypeStruct((h_dim, n_pad), jnp.float32),
        grid_spec=pltpu.PrefetchScalarGridSpec(
            num_scalar_prefetch=0,
            grid=grid,
            in_specs=[
                pl.BlockSpec((x_dim, tb), lambda i: (0, i)),   # x tile (lane-major)
                # Weights/biases: constant index_map -> resident across the grid.
                # (They are a few KB, so their double buffer is noise here.)
                pl.BlockSpec((H, x_dim), lambda i: (0, 0)),    # W1
                pl.BlockSpec((H, 1), lambda i: (0, 0)),        # b1
                pl.BlockSpec((h_dim, H), lambda i: (0, 0)),    # W2
                pl.BlockSpec((h_dim, 1), lambda i: (0, 0)),    # b2
                # Shared PReLU slope: scalar straight from SMEM, no VMEM tile/DMA.
                pl.BlockSpec(memory_space=pltpu.MemorySpace.SMEM),
            ],
            out_specs=pl.BlockSpec((h_dim, tb), lambda i: (0, i)),
        ),
        compiler_params=pltpu.CompilerParams(
            dimension_semantics=("parallel",),
        ),
        cost_estimate=cost,
    )(xT, w1, b1, w2, b2, alpha)

    return oT[:, :n].T


def init_params(key, x_dim, H, h_dim):
    """Deterministic synthetic parameters (shapes follow nn.Linear [out, in] / nn.PReLU)."""
    k1, k2, k3, k4 = jax.random.split(key, 4)
    lim1 = 1.0 / jnp.sqrt(x_dim)
    lim2 = 1.0 / jnp.sqrt(H)
    w1 = jax.random.uniform(k1, (H, x_dim), jnp.float32, -lim1, lim1)
    b1 = jax.random.uniform(k2, (H, 1), jnp.float32, -lim1, lim1)
    w2 = jax.random.uniform(k3, (h_dim, H), jnp.float32, -lim2, lim2)
    b2 = jax.random.uniform(k4, (h_dim, 1), jnp.float32, -lim2, lim2)
    alpha = jnp.full((1,), 0.25, jnp.float32)   # torch.nn.PReLU() default init
    return w1, b1, alpha, w2, b2


if __name__ == "__main__":
    # Small shapes consistent with the module: params = {x_dim, H_dim, h_dim}.
    x_dim, H, h_dim = 4, 32, 16
    batch = 300  # non-multiple of the lane tile -> exercises the padded tail + 2 grid steps

    key = jax.random.PRNGKey(0)
    kx, kp = jax.random.split(key)
    x = jax.random.normal(kx, (batch, x_dim), jnp.float32)
    w1, b1, alpha, w2, b2 = init_params(kp, x_dim, H, h_dim)

    out = event_encoder_forward(x, w1, b1, alpha, w2, b2)
    out = jax.block_until_ready(out)

    ref = _reference_forward(x, w1, b1, alpha, w2, b2)
    assert out.shape == (batch, h_dim)
    assert jnp.allclose(out, ref, atol=1e-5, rtol=1e-5), "mismatch vs reference"

    print("KERNEL_OK")
</pallas_src>

<mosaic_0001>
module attributes {stable_mosaic.version = 11 : i64} {
  func.func @_event_encoder_kernel(%arg0: i32, %arg1: memref<4x256xf32, #tpu.memory_space<vmem>>, %arg2: memref<32x4xf32, #tpu.memory_space<vmem>>, %arg3: memref<32x1xf32, #tpu.memory_space<vmem>>, %arg4: memref<16x32xf32, #tpu.memory_space<vmem>>, %arg5: memref<16x1xf32, #tpu.memory_space<vmem>>, %arg6: memref<1xf32, #tpu.memory_space<smem>>, %arg7: memref<16x256xf32, #tpu.memory_space<vmem>>) attributes {dimension_semantics = [#tpu.dimension_semantics<parallel>], iteration_bounds = array<i64: 2>, scalar_prefetch = 0 : i64, scratch_operands = 0 : i64, tpu.core_type = #tpu.core_type<tc>, window_params = [{transform_indices = @transform_0, window_bounds = array<i64: 4, 256>}, {pipeline_mode = #tpu.pipeline_mode<synchronous>, transform_indices = @transform_1, window_bounds = array<i64: 32, 4>}, {pipeline_mode = #tpu.pipeline_mode<synchronous>, transform_indices = @transform_2, window_bounds = array<i64: 32, 1>}, {pipeline_mode = #tpu.pipeline_mode<synchronous>, transform_indices = @transform_3, window_bounds = array<i64: 16, 32>}, {pipeline_mode = #tpu.pipeline_mode<synchronous>, transform_indices = @transform_4, window_bounds = array<i64: 16, 1>}, {transform_indices = @transform_5, window_bounds = array<i64: 1>}, {transform_indices = @transform_6, window_bounds = array<i64: 16, 256>}]} {
    %c0 = arith.constant 0 : index
    %c0_0 = arith.constant 0 : index
    %0 = vector.load %arg1[%c0, %c0_0] : memref<4x256xf32, #tpu.memory_space<vmem>>, vector<4x256xf32>
    %c0_1 = arith.constant 0 : index
    %c0_2 = arith.constant 0 : index
    %1 = vector.load %arg2[%c0_1, %c0_2] : memref<32x4xf32, #tpu.memory_space<vmem>>, vector<32x4xf32>
    %cst = arith.constant dense<0.000000e+00> : vector<32x256xf32>
    %2 = tpu.matmul %1, %0, %cst {dimension_numbers = #tpu.dot_dimension_numbers<[1], [0], [0], [1], [0, 0, 1, 1], [], []>} : vector<32x4xf32>, vector<4x256xf32>, vector<32x256xf32> -> vector<32x256xf32>
    %c0_3 = arith.constant 0 : index
    %c0_4 = arith.constant 0 : index
    %3 = vector.load %arg3[%c0_3, %c0_4] : memref<32x1xf32, #tpu.memory_space<vmem>>, vector<32x1xf32>
    %4 = vector.broadcast %3 : vector<32x1xf32> to vector<32x256xf32>
    %5 = arith.addf %2, %4 : vector<32x256xf32>
    %c0_5 = arith.constant 0 : index
    %6 = memref.load %arg6[%c0_5] : memref<1xf32, #tpu.memory_space<smem>>
    %cst_6 = arith.constant 0.000000e+00 : f32
    %7 = vector.broadcast %cst_6 : f32 to vector<32x256xf32>
    %8 = arith.cmpf oge, %5, %7 : vector<32x256xf32>
    %9 = vector.broadcast %6 : f32 to vector<32x256xf32>
    %10 = arith.mulf %9, %5 : vector<32x256xf32>
    %11 = arith.select %8, %5, %10 : vector<32x256xi1>, vector<32x256xf32>
    %c0_7 = arith.constant 0 : index
    %c0_8 = arith.constant 0 : index
    %12 = vector.load %arg4[%c0_7, %c0_8] : memref<16x32xf32, #tpu.memory_space<vmem>>, vector<16x32xf32>
    %cst_9 = arith.constant dense<0.000000e+00> : vector<16x256xf32>
    %13 = tpu.matmul %12, %11, %cst_9 {dimension_numbers = #tpu.dot_dimension_numbers<[1], [0], [0], [1], [0, 0, 1, 1], [], []>} : vector<16x32xf32>, vector<32x256xf32>, vector<16x256xf32> -> vector<16x256xf32>
    %c0_10 = arith.constant 0 : index
    %c0_11 = arith.constant 0 : index
    %14 = vector.load %arg5[%c0_10, %c0_11] : memref<16x1xf32, #tpu.memory_space<vmem>>, vector<16x1xf32>
    %15 = vector.broadcast %14 : vector<16x1xf32> to vector<16x256xf32>
    %16 = arith.addf %13, %15 : vector<16x256xf32>
    %c0_12 = arith.constant 0 : index
    %c0_13 = arith.constant 0 : index
    %17 = vector.load %arg7[%c0_12, %c0_13] : memref<16x256xf32, #tpu.memory_space<vmem>>, vector<16x256xf32>
    tpu.vector_store %arg7[%c0_12, %c0_13], %16 {strides = array<i32>} : memref<16x256xf32, #tpu.memory_space<vmem>>, vector<16x256xf32>,
    return
  }
  func.func @transform_0(%arg0: i32) -> (i32, i32) {
    %c0_i32 = arith.constant 0 : i32
    %c0_i32_0 = arith.constant 0 : i32
    return %c0_i32, %arg0 : i32, i32
  }
  func.func @transform_1(%arg0: i32) -> (i32, i32) {
    %c0_i32 = arith.constant 0 : i32
    %c0_i32_0 = arith.constant 0 : i32
    %c0_i32_1 = arith.constant 0 : i32
    return %c0_i32, %c0_i32_0 : i32, i32
  }
  func.func @transform_2(%arg0: i32) -> (i32, i32) {
    %c0_i32 = arith.constant 0 : i32
    %c0_i32_0 = arith.constant 0 : i32
    %c0_i32_1 = arith.constant 0 : i32
    return %c0_i32, %c0_i32_0 : i32, i32
  }
  func.func @transform_3(%arg0: i32) -> (i32, i32) {
    %c0_i32 = arith.constant 0 : i32
    %c0_i32_0 = arith.constant 0 : i32
    %c0_i32_1 = arith.constant 0 : i32
    return %c0_i32, %c0_i32_0 : i32, i32
  }
  func.func @transform_4(%arg0: i32) -> (i32, i32) {
    %c0_i32 = arith.constant 0 : i32
    %c0_i32_0 = arith.constant 0 : i32
    %c0_i32_1 = arith.constant 0 : i32
    return %c0_i32, %c0_i32_0 : i32, i32
  }
  func.func @transform_5(%arg0: i32) -> i32 {
    %c0_i32 = arith.constant 0 : i32
    %c0_i32_0 = arith.constant 0 : i32
    return %c0_i32 : i32
  }
  func.func @transform_6(%arg0: i32) -> (i32, i32) {
    %c0_i32 = arith.constant 0 : i32
    %c0_i32_0 = arith.constant 0 : i32
    return %c0_i32, %arg0 : i32, i32
  }
}

</mosaic_0001>

<bundles_post_ra>
// kernel: event_encoder_forward.1
= control target key start
LH: loop header
LB: loop body
LE: loop exit
PB: predicated region body
PF: predicated region fallthrough
CT: control target
= control target key end

     0   :  { %s814_s0 = inlined_call_operand.vmem [shape: f32[4,512], index: 0, kind: input, shape index: {}]   ;;  %s815_s1 = inlined_call_operand.vmem [shape: f32[32,4], index: 1, kind: input, shape index: {}]   ;;  %s816_s2 = inlined_call_operand.vmem [shape: f32[32,1], index: 2, kind: input, shape index: {}]   ;;  %s817_s3 = inlined_call_operand.vmem [shape: f32[16,32], index: 3, kind: input, shape index: {}]   ;;  %s818_s4 = inlined_call_operand.vmem [shape: f32[16,1], index: 4, kind: input, shape index: {}]   ;;  %s819_s5 = inlined_call_operand.<no memory space> [shape: f32[1], index: 5, kind: input, shape index: {}]   ;;  %s820_s6 = inlined_call_operand.vmem [shape: f32[16,512], index: 6, kind: output, shape index: {}]  }
   0x1   :  { %11 = sst [smem:[#allocation2]] %s819_s5 }
   0x2   :  { %s722_s23 = smov 0   ;;  %s724_s24 = smov 0  }
   0x3   :  { %s726_s25 = smov 0  }
   0x4 LB: > { %s735_s5 = sadd.s32 4294967295, %s680_s25   ;;  %s737_s26 = sadd.s32 1, %s680_s25   ;;  %s680_s25 = sphi %s726_s25, %s824_s25   ;;  %s676_s24 = sphi %s724_s24, %s823_s24   ;;  %s672_s23 = sphi %s722_s23, %s822_s23  }
   0x5   : > { %s152_s27 = ssub.s32 %s680_s25, %s737_s26  ;;  %s155_s28 = sadd.s32 1, %s676_s24 }
   0x6   : > { %p153_p0 = scmp.eq.s32.totalorder %s152_s27, 0  ;;  %p165_p1 = scmp.ne.s32.totalorder %s676_s24, %s672_s23 }
   0x7   : > { %p166_p2 = scmp.eq.s32.totalorder %s735_s5, 1  ;;  %p603_p3 = scmp.ge.s32.totalorder %s680_s25, 1 }
   0x8   : > { %s745_s29 = scalar_select %p153_p0, %s676_s24, %s155_s28  }
   0x9   : > { %p747_p4 = por %p166_p2, %p165_p1  ;;  %p214_p5 = scmp.lt.s32.totalorder %s680_s25, 3 }
   0xb   : > { %p215_p6 = pnand %p603_p3, %p214_p5 }
   0xc   : > { %s605_s7 = sshll.u32 (!%p215_p6), %s735_s5, 1  ;;  %v682_v0 = vmov (!%p215_p6), 0.0   ;;  %v255_v1 = vld [vmem:[%s816_s2] sm:$0xff] (!%p215_p6)  ;;  %v683_v2 = vmov (!%p215_p6), 0   ;;  %v257_v3 = vld [vmem:[%s816_s2 + $0x10] sm:$0xff] (!%p215_p6)  ;;  %v256_v4 = vld [vmem:[%s816_s2 + $0x8] sm:$0xff] (!%p215_p6) }
   0xd   : > { %218 = sbr.rel (%p215_p6) target bundleno = 492 (0x1ec), region = 44  ;;  %p244_p7 = scmp.lt.s32.totalorder (!%p215_p6), %s605_s7, 3  ;;  %363 = vmatprep.mubr.f32.mxu0 (!%p215_p6), %v682_v0  ;;  %499 = vmatprep.mubr.f32.mxu1 (!%p215_p6), %v682_v0  ;;  %v258_v5 = vld [vmem:[%s816_s2 + $0x18] sm:$0xff] (!%p215_p6)  ;;  %vm294_vm0 = vcmask (!%p215_p6), 1043456   ;;  %v416_v8 = vld [vmem:[%s818_s4] sm:$0xff] (!%p215_p6)  ;;  %vm281_vm1 = vcmask (!%p215_p6), 31744  }
   0xe   : > { %655 = vset.pattern.permute.xlu0 (!%p215_p6), %v683_v2  ;;  %656 = vset.pattern.permute.xlu1 (!%p215_p6), %v683_v2  ;;  %v251_v9 = vld [vmem:[%s815_s1] sm:$0xff] (!%p215_p6)  ;;  %v417_v10 = vld [vmem:[%s818_s4 + $0x8] sm:$0xff] (!%p215_p6)  ;;  %v253_v12 = vld [vmem:[%s815_s1 + $0x10] sm:$0xff] (!%p215_p6)  ;;  %s388_s13 = sld [smem:[#allocation2]] (!%p215_p6)  ;;  %vm428_vm10 = vcmask (!%p215_p6), 261120   ;;  %s240_s18 = sand.u32 (!%p215_p6), 1, %s672_s23  }
   0xf   : > { %261 = vperm.xlu0 (!%p215_p6), %655, %v255_v1   ;;  %271 = vperm.xlu1 (!%p215_p6), %656, %v257_v3   ;;  %v252_v11 = vld [vmem:[%s815_s1 + $0x8] sm:$0xff] (!%p215_p6)  ;;  %v254_v13 = vld [vmem:[%s815_s1 + $0x18] sm:$0xff] (!%p215_p6)  ;;  %v414_v55 = vld [vmem:[%s817_s3] sm:$0xff] (!%p215_p6) }
  0x10   : > { %v415_v56 = vld [vmem:[%s817_s3 + $0x8] sm:$0xff] (!%p215_p6) }
  0x13   : > { %266 = vperm.xlu0 (!%p215_p6), %655, %v256_v4   ;;  %276 = vperm.xlu1 (!%p215_p6), %656, %v258_v5  }
  0x14   : > { %s826_s7 = smov (!%p244_p7, %s605_s7), 3  ;;  %v397_v18 = vstv %s388_s13  ;;  %s620_s23 = sshll.u32 (%p747_p4), %s735_s5, 4 }
  0x15   : > { %s606_s16 = sshll.u32 %s826_s7, 2  ;;  %s525_s25 = scalar_lea.vmem (%p747_p4), %s820_s6, %s620_s23 }
  0x16   : > { %s247_s19 = scalar_lea.vmem %s814_s0, %s606_s16 }
  0x17   : > { %v250_v6 = vld [vmem:[%s247_s19] sm:$0xff]  ;;  %420 = vperm.xlu0 %655, %v416_v8   ;;  %425 = vperm.xlu1 %656, %v417_v10   ;;  %s604_s19 = sshll.u32 %s240_s18, 5 }
  0x18   : > { %v280_v7 = vcombine.high %v250_v6, %v250_v6  ;;  %s242_s20 = scalar_lea.vmem [#allocation3], %s604_s19 }
  0x1a   : > { %607 = vmatprep.subr.msk.mxu0 %vm294_vm0, %v280_v7 }
  0x1b   : > { %608 = vmatpush1.msk.msra.mxu0 %vm294_vm0, %v250_v6 }
  0x1c   : > { %609 = vmatmul.mubr.msk.f32.vlgmr.msra.gmra.mrb[0].mxu0 %vm281_vm1, %v251_v9 }
  0x1d   : > { %369 = vmatprep.mubr.f32.mxu0 %v682_v0 }
  0x20   : > { %610 = vmatmul.mubr.msk.f32.gmra.mrb[2].mxu0 %vm281_vm1, %v252_v11 }
  0x21   : > { %375 = vmatprep.mubr.f32.mxu0 %v682_v0 }
  0x24   : > { %611 = vmatmul.mubr.msk.f32.gmra.mrb[4].mxu0 %vm281_vm1, %v253_v12 }
  0x25   : > { %381 = vmatprep.mubr.f32.mxu0 %v682_v0 }
  0x28   : > { %612 = vmatmul.mubr.msk.f32.gmra.mrb[6].mxu0 %vm281_vm1, %v254_v13 }
  0x8e   : > { %v262_v14 = vpop.permute.xlu0 %261  ;;  %v272_v25 = vpop.permute.xlu1 %271 }
  0x92   : > { %v267_v20 = vpop.permute.xlu0 %266  ;;  %v277_v40 = vpop.permute.xlu1 %276 }
  0x96   : > { %v421_v57 = vpop.permute.xlu0 %420  ;;  %v426_v62 = vpop.permute.xlu1 %425 }
  0xef   : > { %v365_v15 = vpop.f32.mrb[0].mxu0 }
  0xf0   : > { %v366_v16 = vadd.f32 %v365_v15, %v262_v14  ;;  %v367_v17 = vpop.f32.mrb[1].mxu0 }
  0xf1   : > { %v368_v19 = vadd.f32 %v367_v17, %v262_v14 }
  0xf2   : > { %v398_v22 = vmul.f32 %v397_v18, %v366_v16  ;;  %vm389_vm2 = vcmp.ge.f32.partialorder %v366_v16, 0.0 }
  0xf3   : > { %v371_v21 = vpop.f32.mrb[2].mxu0  ;;  %v399_v26 = vmul.f32 %v397_v18, %v368_v19  ;;  %vm390_vm3 = vcmp.ge.f32.partialorder %v368_v19, 0.0 }
  0xf4   : > { %v372_v23 = vadd.f32 %v371_v21, %v267_v20  ;;  %v373_v24 = vpop.f32.mrb[3].mxu0  ;;  %v406_v33 = vsel %vm389_vm2, %v366_v16, %v398_v22 }
  0xf5   : > { %v374_v27 = vadd.f32 %v373_v24, %v267_v20  ;;  %v407_v36 = vsel %vm390_vm3, %v368_v19, %v399_v26 }
  0xf6   : > { %v400_v28 = vmul.f32 %v397_v18, %v372_v23  ;;  %vm391_vm4 = vcmp.ge.f32.partialorder %v372_v23, 0.0 }
  0xf7   : > { %v401_v29 = vmul.f32 %v397_v18, %v374_v27  ;;  %v377_v30 = vpop.f32.mrb[4].mxu0  ;;  %vm392_vm5 = vcmp.ge.f32.partialorder %v374_v27, 0.0 }
  0xf8   : > { %v378_v31 = vadd.f32 %v377_v30, %v272_v25  ;;  %v379_v32 = vpop.f32.mrb[5].mxu0  ;;  %v408_v34 = vsel %vm391_vm4, %v372_v23, %v400_v28 }
  0xf9   : > { %v380_v35 = vadd.f32 %v379_v32, %v272_v25  ;;  %v409_v37 = vsel %vm392_vm5, %v374_v27, %v401_v29  ;;  %v623_v38 = vpack.c.bf16 %v408_v34, %v406_v33 }
  0xfa   : > { %v621_v39 = vpack.c.bf16 %v409_v37, %v407_v36  ;;  %v402_v42 = vmul.f32 %v397_v18, %v378_v31  ;;  %vm393_vm6 = vcmp.ge.f32.partialorder %v378_v31, 0.0 }
  0xfb   : > { %v383_v41 = vpop.f32.mrb[6].mxu0  ;;  %v403_v45 = vmul.f32 %v397_v18, %v380_v35  ;;  %vm394_vm7 = vcmp.ge.f32.partialorder %v380_v35, 0.0 }
  0xfc   : > { %v384_v43 = vadd.f32 %v383_v41, %v277_v40  ;;  %v385_v44 = vpop.f32.mrb[7].mxu0  ;;  %622 = vmatprep.subr.bf16.mxu1 %v621_v39  ;;  %v410_v49 = vsel %vm393_vm6, %v378_v31, %v402_v42 }
  0xfd   : > { %v386_v46 = vadd.f32 %v385_v44, %v277_v40  ;;  %624 = vmatpush1.bf16.msra.mxu1 %v623_v38  ;;  %v411_v51 = vsel %vm394_vm7, %v380_v35, %v403_v45 }
  0xfe   : > { %vm395_vm8 = vcmp.ge.f32.partialorder %v384_v43, 0.0  ;;  %v404_v47 = vmul.f32 %v397_v18, %v384_v43 }
  0xff   : > { %vm396_vm9 = vcmp.ge.f32.partialorder %v386_v46, 0.0  ;;  %v405_v48 = vmul.f32 %v397_v18, %v386_v46 }
 0x100   : > { %v412_v50 = vsel %vm395_vm8, %v384_v43, %v404_v47 }
 0x101   : > { %v413_v52 = vsel %vm396_vm9, %v386_v46, %v405_v48  ;;  %v627_v53 = vpack.c.bf16 %v412_v50, %v410_v49 }
 0x102   : > { %v625_v54 = vpack.c.bf16 %v413_v52, %v411_v51 }
 0x104   : > { %626 = vmatprep.subr.bf16.mxu1 %v625_v54 }
 0x105   : > { %628 = vmatpush1.bf16.msra.mxu1 %v627_v53 }
 0x108   : > { %613 = vmatmul.mubr.msk.f32.vlgmr.msra.gmra.mrb[0].mxu1 %vm428_vm10, %v414_v55 }
 0x109   : > { %505 = vmatprep.mubr.f32.mxu1 %v682_v0 }
 0x10c   : > { %614 = vmatmul.mubr.msk.f32.gmra.mrb[2].mxu1 %vm428_vm10, %v415_v56 }
 0x1db   : > { %v501_v58 = vpop.f32.mrb[0].mxu1 }
 0x1dc   : > { %v502_v59 = vadd.f32 %v501_v58, %v421_v57  ;;  %v503_v60 = vpop.f32.mrb[1].mxu1 }
 0x1dd   : > { %v504_v61 = vadd.f32 %v503_v60, %v421_v57  ;;  %522 = sbr.rel (!%p747_p4) target bundleno = 492 (0x1ec), region = 48 }
 0x1de   : > { %512 = vst [vmem:[%s242_s20] sm:$0xff] %v502_v59 }
 0x1df   : > { %513 = vst [vmem:[%s242_s20 + $0x8] sm:$0xff] %v504_v61  ;;  %v507_v63 = vpop.f32.mrb[2].mxu1 }
 0x1e0   : > { %v508_v1 = vadd.f32 %v507_v63, %v426_v62  ;;  %v509_v2 = vpop.f32.mrb[3].mxu1 }
 0x1e1   : > { %v510_v0 = vadd.f32 %v509_v2, %v426_v62 }
 0x1e2   : > { %514 = vst [vmem:[%s242_s20 + $0x10] sm:$0xff] %v508_v1 }
 0x1e3   : > { %515 = vst [vmem:[%s242_s20 + $0x18] sm:$0xff] %v510_v0 }
 0x1e5   : > { %v538_v3 = vld [vmem:[%s242_s20] sm:$0xff] }
 0x1e6   : > { %v540_v4 = vld [vmem:[%s242_s20 + $0x8] sm:$0xff]  ;;  %539 = vst [vmem:[%s525_s25] sm:$0xff] %v538_v3 }
 0x1e7   : > { %541 = vst [vmem:[%s525_s25 + $0x8] sm:$0xff] %v540_v4 }
 0x1e9   : > { %v542_v5 = vld [vmem:[%s242_s20 + $0x10] sm:$0xff] }
 0x1ea   : > { %v544_v6 = vld [vmem:[%s242_s20 + $0x18] sm:$0xff]  ;;  %543 = vst [vmem:[%s525_s25 + $0x20] sm:$0xff] %v542_v5 }
 0x1eb   : > { %545 = vst [vmem:[%s525_s25 + $0x28] sm:$0xff] %v544_v6 }
 0x1ec PF: > { %p14_p8 = scmp.ge.s32.totalorder %s737_s26, 4   ;;  %s822_s23 = smov %s676_s24 }
 0x1ed   : > { %s823_s24 = smov %s745_s29  ;;  %s824_s25 = smov %s737_s26 }
 0x1ee   :  { %16 = sbr.rel (!%p14_p8) target bundleno = 4 (0x4), region = 97 }

</bundles_post_ra>
